<compile_context>
chip_gen: v7x
topology: tpu7x:2x2x1
jax: 0.10.0
libtpu: 0.0.40
codegen_flags: <defaults>
</compile_context>

<pallas_src>
import jax
import jax.numpy as jnp
from jax.experimental import pallas as pl
from jax.experimental.pallas import tpu as pltpu

DICE_WEIGHT = 0.5
BOUNDARY_WEIGHT = 0.05
EPS_DICE = 1e-6
EPS_EDGE = 1e-6

SOBEL_X = ((-1.0, 0.0, 1.0), (-2.0, 0.0, 2.0), (-1.0, 0.0, 1.0))
SOBEL_Y = ((-1.0, -2.0, -1.0), (0.0, 0.0, 0.0), (1.0, 2.0, 1.0))


def _loss_sums_kernel(x_ref, t_ref, out_ref):
    """Per-image partial sums for the loss.

    out_ref (VMEM, f32[8, 128]); value replicated across lanes of each row:
      row 0: sum of elementwise BCE-with-logits
      row 1: sum of sigmoid(x)
      row 2: sum of targets
      row 3: sum of sigmoid(x) * targets
      row 4: sum of |edge_pred - edge_target|   (Sobel magnitude, clamped to [0,10])
    """
    H, W = x_ref.shape
    x = x_ref[...].astype(jnp.float32)
    t = t_ref[...].astype(jnp.float32)

    # ---- BCE + sigmoid sharing a single exp (EUP) per element -------------------
    e = jnp.exp(-jnp.abs(x))                      # exp(-|x|), in (0, 1]
    inv = 1.0 / (1.0 + e)
    sig = jnp.where(x >= 0.0, inv, e * inv)       # numerically stable sigmoid
    # Stable BCE-with-logits: max(x,0) - x*t + log(1 + exp(-|x|)); reuses `e`.
    # (log1p would be marginally more precise; plain log(1+e) keeps lowering simple.)
    bce_el = jnp.maximum(x, 0.0) - x * t + jnp.log(1.0 + e)

    # ---- Boundary term: separable 3x3 Sobel with zero padding -------------------
    tc = jnp.clip(t, 0.0, 1.0)

    # Horizontal +/-1 neighbours via lane rolls; border masks come from rolling an iota
    # with the same shifts, so the construction is independent of the roll direction
    # convention and handles the borders (zero padding) exactly.
    col = jax.lax.broadcasted_iota(jnp.int32, (H, W), 1)
    col_a = pltpu.roll(col, 1, 1)
    col_b = pltpu.roll(col, W - 1, 1)
    m_a_prev = col_a == col - 1
    m_b_prev = col_b == col - 1
    m_a_next = col_a == col + 1
    m_b_next = col_b == col + 1

    def lane_neighbors(p):
        r_a = pltpu.roll(p, 1, 1)
        r_b = pltpu.roll(p, W - 1, 1)
        z = jnp.zeros_like(p)
        prev = jnp.where(m_a_prev, r_a, jnp.where(m_b_prev, r_b, z))  # p[:, j-1] (0 at j=0)
        nxt = jnp.where(m_a_next, r_a, jnp.where(m_b_next, r_b, z))   # p[:, j+1] (0 at j=W-1)
        return prev, nxt

    # Vertical 3-tap passes as banded (H,H) matmuls on the MXU; zero padding is implicit
    # because out-of-range taps are simply absent from the band.
    ri = jax.lax.broadcasted_iota(jnp.int32, (H, H), 0)
    ci = jax.lax.broadcasted_iota(jnp.int32, (H, H), 1)
    d = ci - ri
    zhh = jnp.zeros((H, H), jnp.float32)
    smooth_v = (jnp.where(d == 0, 2.0, zhh)
                + jnp.where(d == 1, 1.0, zhh)
                + jnp.where(d == -1, 1.0, zhh))                        # [1, 2, 1] along H
    diff_v = jnp.where(d == 1, 1.0, zhh) - jnp.where(d == -1, 1.0, zhh)  # [-1, 0, 1] along H

    def edge_mag(p):
        prev, nxt = lane_neighbors(p)
        hx = nxt - prev                  # [-1, 0, 1] along W
        hy = prev + 2.0 * p + nxt        # [ 1, 2, 1] along W
        gx = jnp.dot(smooth_v, hx, preferred_element_type=jnp.float32)
        gy = jnp.dot(diff_v, hy, preferred_element_type=jnp.float32)
        return jnp.clip(jnp.sqrt(gx * gx + gy * gy + EPS_EDGE), 0.0, 10.0)

    edge_p = edge_mag(sig)
    edge_t = edge_mag(tc)

    # ---- Emit the 5 block partial sums as one lane-dense (8,128) tile -----------
    row = jax.lax.broadcasted_iota(jnp.int32, (8, 128), 0)
    z_out = jnp.zeros((8, 128), jnp.float32)
    tile = jnp.where(row == 0, jnp.sum(bce_el), z_out)
    tile = tile + jnp.where(row == 1, jnp.sum(sig), z_out)
    tile = tile + jnp.where(row == 2, jnp.sum(t), z_out)
    tile = tile + jnp.where(row == 3, jnp.sum(sig * t), z_out)
    tile = tile + jnp.where(row == 4, jnp.sum(jnp.abs(edge_p - edge_t)), z_out)
    out_ref[...] = tile


def dice_bce_boundary_loss(inputs, targets,
                           dice_weight=DICE_WEIGHT,
                           boundary_weight=BOUNDARY_WEIGHT):
    """inputs, targets: NCHW logits / {0,1}-ish targets.  Returns scalar f32."""
    assert inputs.shape == targets.shape
    n, c, h, w = inputs.shape
    nb = n * c
    # bf16 (or other) inputs are welcome: they are upcast to f32 inside the kernel,
    # halving HBM traffic for this memory-bound reduction.
    x = inputs.reshape(nb, h, w)
    t = targets.reshape(nb, h, w)

    block_sums = pl.pallas_call(
        _loss_sums_kernel,
        out_shape=jax.ShapeDtypeStruct((nb, 8, 128), jnp.float32),
        grid=(nb,),
        in_specs=[pl.BlockSpec((None, h, w), lambda b: (b, 0, 0)),
                  pl.BlockSpec((None, h, w), lambda b: (b, 0, 0))],
        out_specs=pl.BlockSpec((None, 8, 128), lambda b: (b, 0, 0)),
        compiler_params=pltpu.CompilerParams(
            dimension_semantics=("parallel",),
            vmem_limit_bytes=32 * 1024 * 1024),
    )(x, t)
    # TODO(synk): for very large H the per-image block should additionally be tiled over
    # rows with a 1-row halo; per-image blocks are sufficient for typical mask sizes.

    tot = jnp.sum(block_sums[:, :5, 0], axis=0)            # (5,) global sums
    count = jnp.float32(n * c * h * w)
    bce = tot[0] / count
    dice = 1.0 - (2.0 * tot[3] + EPS_DICE) / (tot[1] + tot[2] + EPS_DICE)

    if c == 1:
        boundary = tot[4] / count
    else:
        # PyTorch's (1,1,3,3) Sobel conv raises for C != 1; the module catches the
        # exception and falls back to boundary = 0.
        boundary = jnp.float32(0.0)

    # TODO(synk): the PyTorch try/except + print warnings have no Pallas equivalent;
    # the NaN/Inf fallbacks are reproduced with jnp.where.
    boundary = jnp.where(jnp.isnan(boundary) | jnp.isinf(boundary),
                         jnp.float32(0.0), boundary)
    total = ((1.0 - dice_weight - boundary_weight) * bce
             + dice_weight * dice + boundary_weight * boundary)
    total = jnp.where(jnp.isnan(total) | jnp.isinf(total),
                      0.5 * bce + 0.5 * dice, total)
    return total


def _reference_loss(inputs, targets,
                    dice_weight=DICE_WEIGHT, boundary_weight=BOUNDARY_WEIGHT):
    """Pure-JAX reference (mirrors the PyTorch forward) for a sanity check."""
    x = inputs.astype(jnp.float32)
    t = targets.astype(jnp.float32)
    bce = jnp.mean(jnp.maximum(x, 0.0) - x * t + jnp.log1p(jnp.exp(-jnp.abs(x))))
    sig = jax.nn.sigmoid(x)
    inter = jnp.sum(sig * t)
    dice = 1.0 - (2.0 * inter + EPS_DICE) / (jnp.sum(sig) + jnp.sum(t) + EPS_DICE)

    kx = jnp.array(SOBEL_X, jnp.float32).reshape(1, 1, 3, 3)
    ky = jnp.array(SOBEL_Y, jnp.float32).reshape(1, 1, 3, 3)
    conv = lambda a, k: jax.lax.conv_general_dilated(
        a, k, (1, 1), ((1, 1), (1, 1)), dimension_numbers=("NCHW", "OIHW", "NCHW"))
    tc = jnp.clip(t, 0.0, 1.0)
    ep = jnp.clip(jnp.sqrt(conv(sig, kx) ** 2 + conv(sig, ky) ** 2 + EPS_EDGE), 0.0, 10.0)
    et = jnp.clip(jnp.sqrt(conv(tc, kx) ** 2 + conv(tc, ky) ** 2 + EPS_EDGE), 0.0, 10.0)
    boundary = jnp.mean(jnp.abs(ep - et))
    return ((1.0 - dice_weight - boundary_weight) * bce
            + dice_weight * dice + boundary_weight * boundary)


if __name__ == "__main__":
    key = jax.random.PRNGKey(0)
    k1, k2 = jax.random.split(key)
    N, C, H, W = 2, 1, 16, 16
    inputs = jax.random.normal(k1, (N, C, H, W), jnp.float32) * 2.0        # logits
    targets = (jax.random.uniform(k2, (N, C, H, W)) > 0.5).astype(jnp.float32)

    loss = jax.block_until_ready(dice_bce_boundary_loss(inputs, targets))
    ref = jax.block_until_ready(_reference_loss(inputs, targets))
    assert jnp.isfinite(loss), "kernel produced non-finite loss"
    assert jnp.allclose(loss, ref, atol=1e-4, rtol=1e-4), (loss, ref)
    print("KERNEL_OK")
</pallas_src>

<mosaic_0001>
module attributes {stable_mosaic.version = 11 : i64} {
  func.func @_loss_sums_kernel(%arg0: i32, %arg1: memref<1x16x16xf32, #tpu.memory_space<vmem>>, %arg2: memref<1x16x16xf32, #tpu.memory_space<vmem>>, %arg3: memref<1x8x128xf32, #tpu.memory_space<vmem>>) attributes {dimension_semantics = [#tpu.dimension_semantics<parallel>], iteration_bounds = array<i64: 2>, scalar_prefetch = 0 : i64, scratch_operands = 0 : i64, tpu.core_type = #tpu.core_type<tc>, window_params = [{transform_indices = @transform_0, window_bounds = array<i64: 1, 16, 16>}, {transform_indices = @transform_1, window_bounds = array<i64: 1, 16, 16>}, {transform_indices = @transform_2, window_bounds = array<i64: 1, 8, 128>}]} {
    %c0 = arith.constant 0 : index
    %c0_0 = arith.constant 0 : index
    %c0_1 = arith.constant 0 : index
    %0 = vector.load %arg1[%c0, %c0_0, %c0_1] : memref<1x16x16xf32, #tpu.memory_space<vmem>>, vector<1x16x16xf32>
    %1 = vector.shape_cast %0 : vector<1x16x16xf32> to vector<16x16xf32>
    %c0_2 = arith.constant 0 : index
    %c0_3 = arith.constant 0 : index
    %c0_4 = arith.constant 0 : index
    %2 = vector.load %arg2[%c0_2, %c0_3, %c0_4] : memref<1x16x16xf32, #tpu.memory_space<vmem>>, vector<1x16x16xf32>
    %3 = vector.shape_cast %2 : vector<1x16x16xf32> to vector<16x16xf32>
    %4 = math.absf %1 : vector<16x16xf32>
    %cst = arith.constant 0.000000e+00 : f32
    %5 = vector.broadcast %cst : f32 to vector<16x16xf32>
    %6 = arith.subf %5, %4 : vector<16x16xf32>
    %7 = math.exp %6 : vector<16x16xf32>
    %cst_5 = arith.constant 1.000000e+00 : f32
    %8 = vector.broadcast %cst_5 : f32 to vector<16x16xf32>
    %9 = arith.addf %8, %7 : vector<16x16xf32>
    %cst_6 = arith.constant 1.000000e+00 : f32
    %10 = vector.broadcast %cst_6 : f32 to vector<16x16xf32>
    %11 = arith.divf %10, %9 : vector<16x16xf32>
    %cst_7 = arith.constant 0.000000e+00 : f32
    %12 = vector.broadcast %cst_7 : f32 to vector<16x16xf32>
    %13 = arith.cmpf oge, %1, %12 : vector<16x16xf32>
    %14 = arith.mulf %7, %11 : vector<16x16xf32>
    %15 = arith.select %13, %11, %14 : vector<16x16xi1>, vector<16x16xf32>
    %cst_8 = arith.constant 0.000000e+00 : f32
    %16 = vector.broadcast %cst_8 : f32 to vector<16x16xf32>
    %17 = arith.maximumf %1, %16 : vector<16x16xf32>
    %18 = arith.mulf %1, %3 : vector<16x16xf32>
    %19 = arith.subf %17, %18 : vector<16x16xf32>
    %cst_9 = arith.constant 1.000000e+00 : f32
    %20 = vector.broadcast %cst_9 : f32 to vector<16x16xf32>
    %21 = arith.addf %20, %7 : vector<16x16xf32>
    %22 = math.log %21 : vector<16x16xf32>
    %23 = arith.addf %19, %22 : vector<16x16xf32>
    %cst_10 = arith.constant 0.000000e+00 : f32
    %cst_11 = arith.constant 1.000000e+00 : f32
    %24 = vector.broadcast %cst_10 : f32 to vector<16x16xf32>
    %25 = arith.maximumf %24, %3 : vector<16x16xf32>
    %26 = vector.broadcast %cst_11 : f32 to vector<16x16xf32>
    %27 = arith.minimumf %26, %25 : vector<16x16xf32>
    %28 = tpu.iota {dimensions = array<i32: 1>} : vector<16x16xi32>
    %c1_i32 = arith.constant 1 : i32
    %29 = tpu.dynamic_rotate %28 by %c1_i32 dim 1 : vector<16x16xi32>, i32 -> vector<16x16xi32>
    %c15_i32 = arith.constant 15 : i32
    %30 = tpu.dynamic_rotate %28 by %c15_i32 dim 1 : vector<16x16xi32>, i32 -> vector<16x16xi32>
    %c1_i32_12 = arith.constant 1 : i32
    %31 = vector.broadcast %c1_i32_12 : i32 to vector<16x16xi32>
    %32 = arith.subi %28, %31 : vector<16x16xi32>
    %33 = arith.cmpi eq, %29, %32 : vector<16x16xi32>
    %c1_i32_13 = arith.constant 1 : i32
    %34 = vector.broadcast %c1_i32_13 : i32 to vector<16x16xi32>
    %35 = arith.subi %28, %34 : vector<16x16xi32>
    %36 = arith.cmpi eq, %30, %35 : vector<16x16xi32>
    %c1_i32_14 = arith.constant 1 : i32
    %37 = vector.broadcast %c1_i32_14 : i32 to vector<16x16xi32>
    %38 = arith.addi %28, %37 : vector<16x16xi32>
    %39 = arith.cmpi eq, %29, %38 : vector<16x16xi32>
    %c1_i32_15 = arith.constant 1 : i32
    %40 = vector.broadcast %c1_i32_15 : i32 to vector<16x16xi32>
    %41 = arith.addi %28, %40 : vector<16x16xi32>
    %42 = arith.cmpi eq, %30, %41 : vector<16x16xi32>
    %43 = tpu.iota {dimensions = array<i32: 0>} : vector<16x16xi32>
    %44 = tpu.iota {dimensions = array<i32: 1>} : vector<16x16xi32>
    %45 = arith.subi %44, %43 : vector<16x16xi32>
    %cst_16 = arith.constant 0.000000e+00 : f32
    %46 = vector.broadcast %cst_16 : f32 to vector<16x16xf32>
    %c0_i32 = arith.constant 0 : i32
    %47 = vector.broadcast %c0_i32 : i32 to vector<16x16xi32>
    %48 = arith.cmpi eq, %45, %47 : vector<16x16xi32>
    %cst_17 = arith.constant 2.000000e+00 : f32
    %49 = vector.broadcast %cst_17 : f32 to vector<16x16xf32>
    %50 = arith.select %48, %49, %46 : vector<16x16xi1>, vector<16x16xf32>
    %c1_i32_18 = arith.constant 1 : i32
    %51 = vector.broadcast %c1_i32_18 : i32 to vector<16x16xi32>
    %52 = arith.cmpi eq, %45, %51 : vector<16x16xi32>
    %cst_19 = arith.constant 1.000000e+00 : f32
    %53 = vector.broadcast %cst_19 : f32 to vector<16x16xf32>
    %54 = arith.select %52, %53, %46 : vector<16x16xi1>, vector<16x16xf32>
    %55 = arith.addf %50, %54 : vector<16x16xf32>
    %c-1_i32 = arith.constant -1 : i32
    %56 = vector.broadcast %c-1_i32 : i32 to vector<16x16xi32>
    %57 = arith.cmpi eq, %45, %56 : vector<16x16xi32>
    %cst_20 = arith.constant 1.000000e+00 : f32
    %58 = vector.broadcast %cst_20 : f32 to vector<16x16xf32>
    %59 = arith.select %57, %58, %46 : vector<16x16xi1>, vector<16x16xf32>
    %60 = arith.addf %55, %59 : vector<16x16xf32>
    %c1_i32_21 = arith.constant 1 : i32
    %61 = vector.broadcast %c1_i32_21 : i32 to vector<16x16xi32>
    %62 = arith.cmpi eq, %45, %61 : vector<16x16xi32>
    %cst_22 = arith.constant 1.000000e+00 : f32
    %63 = vector.broadcast %cst_22 : f32 to vector<16x16xf32>
    %64 = arith.select %62, %63, %46 : vector<16x16xi1>, vector<16x16xf32>
    %c-1_i32_23 = arith.constant -1 : i32
    %65 = vector.broadcast %c-1_i32_23 : i32 to vector<16x16xi32>
    %66 = arith.cmpi eq, %45, %65 : vector<16x16xi32>
    %cst_24 = arith.constant 1.000000e+00 : f32
    %67 = vector.broadcast %cst_24 : f32 to vector<16x16xf32>
    %68 = arith.select %66, %67, %46 : vector<16x16xi1>, vector<16x16xf32>
    %69 = arith.subf %64, %68 : vector<16x16xf32>
    %c1_i32_25 = arith.constant 1 : i32
    %70 = tpu.dynamic_rotate %15 by %c1_i32_25 dim 1 : vector<16x16xf32>, i32 -> vector<16x16xf32>
    %c15_i32_26 = arith.constant 15 : i32
    %71 = tpu.dynamic_rotate %15 by %c15_i32_26 dim 1 : vector<16x16xf32>, i32 -> vector<16x16xf32>
    %cst_27 = arith.constant 0.000000e+00 : f32
    %72 = vector.broadcast %cst_27 : f32 to vector<16x16xf32>
    %73 = arith.select %36, %71, %72 : vector<16x16xi1>, vector<16x16xf32>
    %74 = arith.select %33, %70, %73 : vector<16x16xi1>, vector<16x16xf32>
    %75 = arith.select %42, %71, %72 : vector<16x16xi1>, vector<16x16xf32>
    %76 = arith.select %39, %70, %75 : vector<16x16xi1>, vector<16x16xf32>
    %77 = arith.subf %76, %74 : vector<16x16xf32>
    %cst_28 = arith.constant 2.000000e+00 : f32
    %78 = vector.broadcast %cst_28 : f32 to vector<16x16xf32>
    %79 = arith.mulf %78, %15 : vector<16x16xf32>
    %80 = arith.addf %74, %79 : vector<16x16xf32>
    %81 = arith.addf %80, %76 : vector<16x16xf32>
    %cst_29 = arith.constant dense<0.000000e+00> : vector<16x16xf32>
    %82 = tpu.matmul %60, %77, %cst_29 {dimension_numbers = #tpu.dot_dimension_numbers<[1], [0], [0], [1], [0, 0, 1, 1], [], []>} : vector<16x16xf32>, vector<16x16xf32>, vector<16x16xf32> -> vector<16x16xf32>
    %cst_30 = arith.constant dense<0.000000e+00> : vector<16x16xf32>
    %83 = tpu.matmul %69, %81, %cst_30 {dimension_numbers = #tpu.dot_dimension_numbers<[1], [0], [0], [1], [0, 0, 1, 1], [], []>} : vector<16x16xf32>, vector<16x16xf32>, vector<16x16xf32> -> vector<16x16xf32>
    %84 = arith.mulf %82, %82 : vector<16x16xf32>
    %85 = arith.mulf %83, %83 : vector<16x16xf32>
    %86 = arith.addf %84, %85 : vector<16x16xf32>
    %cst_31 = arith.constant 9.99999997E-7 : f32
    %87 = vector.broadcast %cst_31 : f32 to vector<16x16xf32>
    %88 = arith.addf %86, %87 : vector<16x16xf32>
    %89 = math.sqrt %88 : vector<16x16xf32>
    %cst_32 = arith.constant 0.000000e+00 : f32
    %cst_33 = arith.constant 1.000000e+01 : f32
    %90 = vector.broadcast %cst_32 : f32 to vector<16x16xf32>
    %91 = arith.maximumf %90, %89 : vector<16x16xf32>
    %92 = vector.broadcast %cst_33 : f32 to vector<16x16xf32>
    %93 = arith.minimumf %92, %91 : vector<16x16xf32>
    %c1_i32_34 = arith.constant 1 : i32
    %94 = tpu.dynamic_rotate %27 by %c1_i32_34 dim 1 : vector<16x16xf32>, i32 -> vector<16x16xf32>
    %c15_i32_35 = arith.constant 15 : i32
    %95 = tpu.dynamic_rotate %27 by %c15_i32_35 dim 1 : vector<16x16xf32>, i32 -> vector<16x16xf32>
    %cst_36 = arith.constant 0.000000e+00 : f32
    %96 = vector.broadcast %cst_36 : f32 to vector<16x16xf32>
    %97 = arith.select %36, %95, %96 : vector<16x16xi1>, vector<16x16xf32>
    %98 = arith.select %33, %94, %97 : vector<16x16xi1>, vector<16x16xf32>
    %99 = arith.select %42, %95, %96 : vector<16x16xi1>, vector<16x16xf32>
    %100 = arith.select %39, %94, %99 : vector<16x16xi1>, vector<16x16xf32>
    %101 = arith.subf %100, %98 : vector<16x16xf32>
    %cst_37 = arith.constant 2.000000e+00 : f32
    %102 = vector.broadcast %cst_37 : f32 to vector<16x16xf32>
    %103 = arith.mulf %102, %27 : vector<16x16xf32>
    %104 = arith.addf %98, %103 : vector<16x16xf32>
    %105 = arith.addf %104, %100 : vector<16x16xf32>
    %cst_38 = arith.constant dense<0.000000e+00> : vector<16x16xf32>
    %106 = tpu.matmul %60, %101, %cst_38 {dimension_numbers = #tpu.dot_dimension_numbers<[1], [0], [0], [1], [0, 0, 1, 1], [], []>} : vector<16x16xf32>, vector<16x16xf32>, vector<16x16xf32> -> vector<16x16xf32>
    %cst_39 = arith.constant dense<0.000000e+00> : vector<16x16xf32>
    %107 = tpu.matmul %69, %105, %cst_39 {dimension_numbers = #tpu.dot_dimension_numbers<[1], [0], [0], [1], [0, 0, 1, 1], [], []>} : vector<16x16xf32>, vector<16x16xf32>, vector<16x16xf32> -> vector<16x16xf32>
    %108 = arith.mulf %106, %106 : vector<16x16xf32>
    %109 = arith.mulf %107, %107 : vector<16x16xf32>
    %110 = arith.addf %108, %109 : vector<16x16xf32>
    %cst_40 = arith.constant 9.99999997E-7 : f32
    %111 = vector.broadcast %cst_40 : f32 to vector<16x16xf32>
    %112 = arith.addf %110, %111 : vector<16x16xf32>
    %113 = math.sqrt %112 : vector<16x16xf32>
    %cst_41 = arith.constant 0.000000e+00 : f32
    %cst_42 = arith.constant 1.000000e+01 : f32
    %114 = vector.broadcast %cst_41 : f32 to vector<16x16xf32>
    %115 = arith.maximumf %114, %113 : vector<16x16xf32>
    %116 = vector.broadcast %cst_42 : f32 to vector<16x16xf32>
    %117 = arith.minimumf %116, %115 : vector<16x16xf32>
    %118 = tpu.iota {dimensions = array<i32: 0>} : vector<8x128xi32>
    %cst_43 = arith.constant 0.000000e+00 : f32
    %119 = vector.broadcast %cst_43 : f32 to vector<8x128xf32>
    %c0_i32_44 = arith.constant 0 : i32
    %120 = vector.broadcast %c0_i32_44 : i32 to vector<8x128xi32>
    %121 = arith.cmpi eq, %118, %120 : vector<8x128xi32>
    %122 = vector.shape_cast %23 : vector<16x16xf32> to vector<1x16x16xf32>
    %cst_45 = arith.constant dense<0.000000e+00> : vector<1xf32>
    %123 = vector.multi_reduction <add>, %122, %cst_45 [1, 2] : vector<1x16x16xf32> to vector<1xf32>
    %124 = vector.shape_cast %123 : vector<1xf32> to vector<1x1x1xf32>
    %125 = vector.extract %124[0, 0, 0] : f32 from vector<1x1x1xf32>
    %126 = vector.broadcast %125 : f32 to vector<8x128xf32>
    %127 = arith.select %121, %126, %119 : vector<8x128xi1>, vector<8x128xf32>
    %c1_i32_46 = arith.constant 1 : i32
    %128 = vector.broadcast %c1_i32_46 : i32 to vector<8x128xi32>
    %129 = arith.cmpi eq, %118, %128 : vector<8x128xi32>
    %130 = vector.shape_cast %15 : vector<16x16xf32> to vector<1x16x16xf32>
    %cst_47 = arith.constant dense<0.000000e+00> : vector<1xf32>
    %131 = vector.multi_reduction <add>, %130, %cst_47 [1, 2] : vector<1x16x16xf32> to vector<1xf32>
    %132 = vector.shape_cast %131 : vector<1xf32> to vector<1x1x1xf32>
    %133 = vector.extract %132[0, 0, 0] : f32 from vector<1x1x1xf32>
    %134 = vector.broadcast %133 : f32 to vector<8x128xf32>
    %135 = arith.select %129, %134, %119 : vector<8x128xi1>, vector<8x128xf32>
    %136 = arith.addf %127, %135 : vector<8x128xf32>
    %c2_i32 = arith.constant 2 : i32
    %137 = vector.broadcast %c2_i32 : i32 to vector<8x128xi32>
    %138 = arith.cmpi eq, %118, %137 : vector<8x128xi32>
    %139 = vector.shape_cast %3 : vector<16x16xf32> to vector<1x16x16xf32>
    %cst_48 = arith.constant dense<0.000000e+00> : vector<1xf32>
    %140 = vector.multi_reduction <add>, %139, %cst_48 [1, 2] : vector<1x16x16xf32> to vector<1xf32>
    %141 = vector.shape_cast %140 : vector<1xf32> to vector<1x1x1xf32>
    %142 = vector.extract %141[0, 0, 0] : f32 from vector<1x1x1xf32>
    %143 = vector.broadcast %142 : f32 to vector<8x128xf32>
    %144 = arith.select %138, %143, %119 : vector<8x128xi1>, vector<8x128xf32>
    %145 = arith.addf %136, %144 : vector<8x128xf32>
    %c3_i32 = arith.constant 3 : i32
    %146 = vector.broadcast %c3_i32 : i32 to vector<8x128xi32>
    %147 = arith.cmpi eq, %118, %146 : vector<8x128xi32>
    %148 = arith.mulf %15, %3 : vector<16x16xf32>
    %149 = vector.shape_cast %148 : vector<16x16xf32> to vector<1x16x16xf32>
    %cst_49 = arith.constant dense<0.000000e+00> : vector<1xf32>
    %150 = vector.multi_reduction <add>, %149, %cst_49 [1, 2] : vector<1x16x16xf32> to vector<1xf32>
    %151 = vector.shape_cast %150 : vector<1xf32> to vector<1x1x1xf32>
    %152 = vector.extract %151[0, 0, 0] : f32 from vector<1x1x1xf32>
    %153 = vector.broadcast %152 : f32 to vector<8x128xf32>
    %154 = arith.select %147, %153, %119 : vector<8x128xi1>, vector<8x128xf32>
    %155 = arith.addf %145, %154 : vector<8x128xf32>
    %c4_i32 = arith.constant 4 : i32
    %156 = vector.broadcast %c4_i32 : i32 to vector<8x128xi32>
    %157 = arith.cmpi eq, %118, %156 : vector<8x128xi32>
    %158 = arith.subf %93, %117 : vector<16x16xf32>
    %159 = math.absf %158 : vector<16x16xf32>
    %160 = vector.shape_cast %159 : vector<16x16xf32> to vector<1x16x16xf32>
    %cst_50 = arith.constant dense<0.000000e+00> : vector<1xf32>
    %161 = vector.multi_reduction <add>, %160, %cst_50 [1, 2] : vector<1x16x16xf32> to vector<1xf32>
    %162 = vector.shape_cast %161 : vector<1xf32> to vector<1x1x1xf32>
    %163 = vector.extract %162[0, 0, 0] : f32 from vector<1x1x1xf32>
    %164 = vector.broadcast %163 : f32 to vector<8x128xf32>
    %165 = arith.select %157, %164, %119 : vector<8x128xi1>, vector<8x128xf32>
    %166 = arith.addf %155, %165 : vector<8x128xf32>
    %c0_51 = arith.constant 0 : index
    %c0_52 = arith.constant 0 : index
    %c0_53 = arith.constant 0 : index
    %167 = vector.load %arg3[%c0_51, %c0_52, %c0_53] : memref<1x8x128xf32, #tpu.memory_space<vmem>>, vector<1x8x128xf32>
    %168 = vector.shape_cast %167 : vector<1x8x128xf32> to vector<8x128xf32>
    %169 = vector.shape_cast %166 : vector<8x128xf32> to vector<1x8x128xf32>
    tpu.vector_store %arg3[%c0_51, %c0_52, %c0_53], %169 {strides = array<i32>} : memref<1x8x128xf32, #tpu.memory_space<vmem>>, vector<1x8x128xf32>,
    return
  }
  func.func @transform_0(%arg0: i32) -> (i32, i32, i32) {
    %c0_i32 = arith.constant 0 : i32
    %c0_i32_0 = arith.constant 0 : i32
    %c0_i32_1 = arith.constant 0 : i32
    return %arg0, %c0_i32, %c0_i32_0 : i32, i32, i32
  }
  func.func @transform_1(%arg0: i32) -> (i32, i32, i32) {
    %c0_i32 = arith.constant 0 : i32
    %c0_i32_0 = arith.constant 0 : i32
    %c0_i32_1 = arith.constant 0 : i32
    return %arg0, %c0_i32, %c0_i32_0 : i32, i32, i32
  }
  func.func @transform_2(%arg0: i32) -> (i32, i32, i32) {
    %c0_i32 = arith.constant 0 : i32
    %c0_i32_0 = arith.constant 0 : i32
    %c0_i32_1 = arith.constant 0 : i32
    return %arg0, %c0_i32, %c0_i32_0 : i32, i32, i32
  }
}

</mosaic_0001>

<bundles_post_ra>
// kernel: tpu_custom_call.1
= control target key start
LH: loop header
LB: loop body
LE: loop exit
PB: predicated region body
PF: predicated region fallthrough
CT: control target
= control target key end

     0   :  { %7 = vsyncpa [#allocation3], 0  ;;  %s1707_s0 = inlined_call_operand.hbm [shape: f32[2,16,16], index: 0, kind: input, shape index: {}]   ;;  %s1708_s1 = inlined_call_operand.hbm [shape: f32[2,16,16], index: 1, kind: input, shape index: {}]   ;;  %s1709_s2 = inlined_call_operand.hbm [shape: f32[2,8,128], index: 2, kind: output, shape index: {}]  }
   0x1   :  { %9 = vsyncpa [#allocation3 + $0x1], 0 }
   0x2   :  { %10 = vsyncpa [#allocation6], 0 }
   0x3   :  { %12 = vsyncpa [#allocation6 + $0x1], 0 }
   0x4   :  { %13 = vsyncpa [#allocation4], 0 }
   0x5   :  { %15 = vsyncpa [#allocation4 + $0x1], 0  ;;  %s1337_s9 = smov 0   ;;  %s1339_s10 = smov 0  }
   0x6   :  { %s1341_s11 = smov 0   ;;  %s1343_s12 = smov 0  }
   0x7 LB: > { %s1358_s13 = sadd.s32 4294967295, %s1309_s12   ;;  %s982_s14 = sadd.s32 4294967294, %s1309_s12   ;;  %s1309_s12 = sphi %s1343_s12, %s1725_s12   ;;  %s1305_s11 = sphi %s1341_s11, %s1724_s11   ;;  %s1301_s10 = sphi %s1339_s10, %s1723_s10   ;;  %s1297_s9 = sphi %s1337_s9, %s1722_s9  }
   0x8   : > { %s1362_s15 = sadd.s32 1, %s1309_s12   ;;  %s28_s16 = sadd.s32 1, %s1305_s11 }
   0x9   : > { %s25_s17 = ssub.s32 %s1309_s12, %s1362_s15  ;;  %p35_p0 = scmp.ne.s32.totalorder %s1305_s11, %s1301_s10 }
   0xa   : > { %p26_p1 = scmp.eq.s32.totalorder %s25_s17, 0  ;;  %p36_p2 = scmp.eq.s32.totalorder %s1309_s12, 0 }
   0xb   : > { %p41_p3 = scmp.ne.s32.totalorder %s1301_s10, %s1297_s9  ;;  %p42_p4 = scmp.eq.s32.totalorder %s1358_s13, 0 }
   0xc   : > { %s1374_s18 = scalar_select %p26_p1, %s1305_s11, %s28_s16  }
   0xd   : > { %p1376_p5 = por %p36_p2, %p35_p0  ;;  %p1380_p6 = por %p42_p4, %p41_p3 }
   0xe   : > { %p91_p7 = scmp.eq.s32.totalorder %s1358_s13, 1  ;;  %p97_p8 = scmp.eq.s32.totalorder %s982_s14, 1 }
   0xf   : > { %s1713_s20 = scalar_select %p1380_p6, 1, 0 }
  0x10   : > { %p1097_p10 = scmp.lt.s32.totalorder %s1309_s12, 2  ;;  %p1387_p11 = por %p91_p7, %p35_p0 }
  0x11   : > { %p1391_p12 = por %p97_p8, %p41_p3  ;;  %s1396_s23 = sand.u32 1, %s1305_s11  }
  0x12   : > { %s1714_s21 = scalar_select %p1387_p11, 1, 0 }
  0x13   : > { %s1715_s22 = scalar_select %p1391_p12, 1, 0 }
  0x14   : > { %s1008_s24 = sshll.u32 %s1309_s12, 8  ;;  %s985_s25 = sshll.u32 %s1396_s23, 4 }
  0x15   : > { %s1405_s28 = scalar_lea.hbm %s1707_s0, %s1008_s24  ;;  %s121_s29 = scalar_lea.vmem [#allocation2], %s985_s25 }
  0x16   : > { %s128_s30 = sshll.u32 %s121_s29, 4  ;;  %p1411_p13 = pnand %p1097_p10, %p1376_p5  ;;  %s1415_s30 = int_to_ptr.vmem [resolvable:$true] %s128_s30 }
  0x17   : > { %s118_s4 = scalar_lea.sflag [#allocation3], %s1396_s23  ;;  %s1179_s5 = scalar_lea.hbm %s1405_s28, 256 }
  0x18   : > { %p1180_p0 = scmp.ne.s32.totalorder %s1405_s28, %s1179_s5  ;;  %p1181_p1 = pneg %p1411_p13 }
  0x19   : > { %s1184_s8 = scalar_lea.hbm %s1707_s0, 512  ;;  %p1185_p4 = scmp.lt.u32.totalorder %s1405_s28, %s1707_s0 }
  0x1a   : > { %p1182_p2 = pnand %p1181_p1, %p1180_p0  ;;  %p1186_p5 = scmp.lt.u32.totalorder %s1184_s8, %s1179_s5 }
  0x1b   : > { %p1188_p8 = scmp.lt.u32.totalorder %s1179_s5, %s1405_s28 }
  0x1c   : > { %p1183_p3 = pneg %p1182_p2  ;;  %p1187_p7 = por %p1186_p5, %p1185_p4 }
  0x1e   : > { %p1189_p10 = por %p1188_p8, %p1187_p7 }
  0x20   : > { %p1190_p9 = pnand %p1189_p10, %p1183_p3 }
  0x22   : > { %1193 = shalt.err (!%p1190_p9)
}
  0x23   : > { %s1194_s17 = scalar_lea.vmem %s1415_s30, 256  ;;  %s1311_s19 = smov [#allocation2]  }
  0x24   : > { %p1195_p0 = scmp.ne.s32.totalorder %s1415_s30, %s1194_s17  ;;  %s1199_s26 = sshll.u32 %s1311_s19, 4  ;;  %s1200_s26 = int_to_ptr.vmem [resolvable:$false] %s1199_s26 }
  0x25   : > { %s1201_s27 = scalar_lea.vmem %s1200_s26, 512  ;;  %p1202_p11 = scmp.lt.s32.totalorder %s1415_s30, %s1200_s26 }
  0x26   : > { %p1197_p2 = pnand %p1195_p0, %p1181_p1  ;;  %p1203_p4 = scmp.lt.s32.totalorder %s1201_s27, %s1194_s17 }
  0x28   : > { %p1198_p12 = pneg %p1197_p2  ;;  %p1204_p5 = por %p1203_p4, %p1202_p11 }
  0x2a   : > { %p1205_p7 = pnand %p1204_p5, %p1198_p12 }
  0x2c   : > { %1208 = shalt.err (!%p1205_p7)
}
  0x2d   : > { %s1312_s29 = smov 128   ;;  %s1313_s5 = smov 8  }
  0x2e   : > { %1089 = dma.hbm_to_vmem [thread:$0]  (!%p1411_p13), %s1405_s28, 256, %s1415_s30, %s118_s4, %s1312_s29, %s1312_s29, %s1313_s5  }
  0x2f   : > { %p991_p9 = scmp.ge.s32.totalorder %s1309_s12, 1  ;;  %p157_p11 = scmp.lt.s32.totalorder %s1309_s12, 3 }
  0x30   : > { %s1459_s14 = scalar_lea.hbm %s1708_s1, %s1008_s24  ;;  %s142_s16 = scalar_lea.vmem [#allocation5], %s985_s25 }
  0x31   : > { %p1450_p12 = pnand %p991_p9, %p157_p11  ;;  %s149_s17 = sshll.u32 %s142_s16, 4  ;;  %s1463_s17 = int_to_ptr.vmem [resolvable:$true] %s149_s17 }
  0x32   : > { %s139_s28 = scalar_lea.sflag [#allocation6], %s1396_s23  ;;  %s1209_s30 = scalar_lea.hbm %s1459_s14, 256 }
  0x33   : > { %p1210_p3 = scmp.ne.s32.totalorder %s1459_s14, %s1209_s30  ;;  %s1214_s24 = scalar_lea.hbm %s1708_s1, 512 }
  0x34   : > { %p1215_p0 = scmp.lt.u32.totalorder %s1459_s14, %s1708_s1  ;;  %p1216_p2 = scmp.lt.u32.totalorder %s1214_s24, %s1209_s30 }
  0x35   : > { %p1212_p8 = pnand %p1210_p3, %p1181_p1  ;;  %p1218_p5 = scmp.lt.u32.totalorder %s1209_s30, %s1459_s14 }
  0x36   : > { %p1217_p4 = por %p1216_p2, %p1215_p0 }
  0x37   : > { %p1213_p10 = pneg %p1212_p8 }
  0x38   : > { %p1219_p7 = por %p1218_p5, %p1217_p4 }
  0x3a   : > { %p1220_p9 = pnand %p1219_p7, %p1213_p10 }
  0x3c   : > { %1223 = shalt.err (!%p1220_p9)
}
  0x3d   : > { %s1224_s25 = scalar_lea.vmem %s1463_s17, 256  ;;  %s1314_s7 = smov [#allocation5]  }
  0x3e   : > { %p1225_p11 = scmp.ne.s32.totalorder %s1463_s17, %s1224_s25  ;;  %s1229_s8 = sshll.u32 %s1314_s7, 4  ;;  %s1230_s8 = int_to_ptr.vmem [resolvable:$false] %s1229_s8 }
  0x3f   : > { %s1231_s16 = scalar_lea.vmem %s1230_s8, 512  ;;  %p1232_p6 = scmp.lt.s32.totalorder %s1463_s17, %s1230_s8 }
  0x40   : > { %p1227_p3 = pnand %p1225_p11, %p1181_p1  ;;  %p1233_p0 = scmp.lt.s32.totalorder %s1231_s16, %s1224_s25 }
  0x42   : > { %p1228_p8 = pneg %p1227_p3  ;;  %p1234_p2 = por %p1233_p0, %p1232_p6 }
  0x44   : > { %p1235_p4 = pnand %p1234_p2, %p1228_p8 }
  0x46   : > { %1238 = shalt.err (!%p1235_p4)
}
  0x47   : > { %1092 = dma.hbm_to_vmem [thread:$0]  (!%p1411_p13), %s1459_s14, 256, %s1463_s17, %s139_s28, %s1312_s29, %s1312_s29, %s1313_s5  }
  0x48   : > { %161 = sbr.rel (%p1450_p12) target bundleno = 1077 (0x435), region = 28  ;;  %s1497_s30 = sand.u32 (!%p1450_p12), 1, %s1301_s10  }
  0x49   : > { %s992_s4 = sshll.u32 (!%p1450_p12), %s1497_s30, 4  ;;  %s164_s19 = scalar_lea.sflag (!%p1450_p12), [#allocation3], %s1497_s30 }
  0x4a   : > { %s167_s3 = scalar_lea.vmem (!%p1450_p12), [#allocation2], %s992_s4  ;;  %p1718_p6 = scmp.ne.s32.totalorder (!%p1450_p12), %s1713_s20, 0 }
  0x4f   : > { %1284 = dma.done.wait (%p1718_p6), %s164_s19, 256  }
  0x50   : > { %1286 = vsyncadd (%p1718_p6), %s164_s19, 4294967040  ;;  %s173_s23 = scalar_lea.sflag [#allocation6], %s1497_s30  ;;  %s176_s29 = scalar_lea.vmem [#allocation5], %s992_s4 }
  0x51   : > { %1288 = dma.done.wait (%p1718_p6), %s173_s23, 256  }
  0x52   : > { %1290 = vsyncadd (%p1718_p6), %s173_s23, 4294967040  ;;  %v242_v0 = vlaneseq  ;;  %s1315_s5 = smov 16   ;;  %v1515_v2 = vld [vmem:[%s167_s3 + $0x8] sm:$0xff]  ;;  %v1517_v3 = vld [vmem:[%s167_s3] sm:$0xff]  ;;  %s1316_s20 = smov 1   ;;  %vm244_vm2 = vcmask 1047680  }
  0x53   : > { %v207_v4 = vand.u32 2147483647, %v1515_v2  ;;  %v206_v5 = vand.u32 2147483647, %v1517_v3  ;;  %v1527_v14 = vld [vmem:[%s176_s29] sm:$0xff]  ;;  %v1529_v15 = vld [vmem:[%s176_s29 + $0x8] sm:$0xff] }
  0x54   : > { %v1511_v1 = vand.u32 127, %v242_v0  ;;  %vm221_vm0 = vcmp.ge.f32.partialorder %v1515_v2, 0.0  ;;  %v238_v17 = vmax.f32 %v1527_v14, 0.0  ;;  %vm220_vm1 = vcmp.ge.f32.partialorder %v1517_v3, 0.0  ;;  %s1317_s6 = smov 15   ;;  %s1318_s14 = smov 14  }
  0x55   : > { %v209_v6 = vsub.f32 0.0, %v207_v4  ;;  %v208_v7 = vsub.f32 0.0, %v206_v5  ;;  %v239_v20 = vmax.f32 %v1529_v15, 0.0  ;;  %vm348_vm10 = vcmask 130048   ;;  %s1320_s17 = smov 113   ;;  %s994_s25 = sshll.u32 %s1497_s30, 3 }
  0x56   : > { %245 = vrot.lane.b32.xlu0 %v1511_v1, %s1315_s5  ;;  %v240_v24 = vmin.f32 %v238_v17, 1.0  ;;  %v258_v26 = vadd.s32 1, %v1511_v1  ;;  %v995_v27 = vadd.s32 4294967295, %v1511_v1  ;;  %v1319_v17 = vmov 0.0   ;;  %s1005_s7 = sshll.u32 %s1358_s13, 7  ;;  %s201_s16 = scalar_lea.vmem [#allocation7], %s994_s25 }
  0x57   : > { %v212_v8 = vmul.f32 1.442695, %v209_v6  ;;  %v210_v9 = vmul.f32 1.442695, %v208_v7  ;;  %v241_v25 = vmin.f32 %v239_v20, 1.0  ;;  %s889_s4 = sshll.u32 %s201_s16, 4  ;;  %s1663_s23 = scalar_lea.hbm %s1709_s2, %s1005_s7  ;;  %s1665_s4 = int_to_ptr.vmem [resolvable:$true] %s889_s4 }
  0x58   : > { %v583_v40 = vmul.f32 2.0, %v240_v24  ;;  %s876_s29 = scalar_lea.sflag [#allocation4], %s1497_s30  ;;  %s1239_s13 = scalar_lea.vmem %s1665_s4, 128 }
  0x59   : > { %1159 = vpow2.f32 %v212_v8  ;;  %v584_v41 = vmul.f32 2.0, %v241_v25  ;;  %v1583_v8 = vshrl.u32 %v242_v0, 7  ;;  %p1240_p13 = scmp.ne.s32.totalorder %s1665_s4, %s1239_s13  ;;  %p1719_p1 = scmp.ne.s32.totalorder %s1714_s21, 0 }
  0x5a   : > { %1161 = vpow2.f32 %v210_v9 }
  0x5b   : > { %p1241_p12 = pnand %p1240_p13, %p1719_p1 }
  0x5d   : > { %p1242_p10 = pneg %p1241_p12 }
  0x63   : > { %v1160_v10 = vpop.eup %1159 }
  0x64   : > { %v1162_v11 = vpop.eup %1161  ;;  %v1521_v12 = vadd.f32 1.0, %v1160_v10 }
  0x65   : > { %v1523_v13 = vadd.f32 1.0, %v1162_v11 }
  0x66   : > { %1163 = vrcp.f32 %v1521_v12 }
  0x67   : > { %1165 = vrcp.f32 %v1523_v13 }
  0x68   : > { %1167 = vlog2.f32 %v1523_v13 }
  0x69   : > { %1169 = vlog2.f32 %v1521_v12 }
  0x70   : > { %v1164_v16 = vpop.eup %1163 }
  0x71   : > { %v1166_v18 = vpop.eup %1165  ;;  %v223_v19 = vmul.f32 %v1164_v16, %v1160_v10 }
  0x72   : > { %v222_v21 = vmul.f32 %v1166_v18, %v1162_v11  ;;  %v268_v11 = vsub.s32 %v1511_v1, %v1583_v8 }
  0x73   : > { %v1535_v22 = vsel %vm221_vm0, %v1164_v16, %v223_v19 }
  0x74   : > { %291 = vrot.lane.b32.xlu1 %v1535_v22, %s1315_s5  ;;  %v1539_v23 = vsel %vm220_vm1, %v1166_v18, %v222_v21  ;;  %v327_v39 = vmul.f32 2.0, %v1535_v22  ;;  %vm270_vm5 = vcmp.eq.s32.totalorder %v268_v11, 0  ;;  %vm274_vm6 = vcmp.eq.s32.totalorder %v268_v11, 1 }
  0x75   : > { %288 = vrot.lane.b32.xlu0 %v1539_v23, %s1315_s5  ;;  %v326_v38 = vmul.f32 2.0, %v1539_v23  ;;  %v272_v18 = vsel %vm270_vm5, 2.0, %v1319_v17  ;;  %v276_v19 = vsel %vm274_vm6, 1.0, %v1319_v17  ;;  %vm280_vm8 = vcmp.eq.s32.totalorder %v268_v11, 4294967295 }
  0x76   : > { %v278_v21 = vadd.f32 %v276_v19, %v272_v18  ;;  %v805_v13 = vsel %vm348_vm10, %v1539_v23, 0.0  ;;  %v806_v12 = vsel %vm348_vm10, %v1535_v22, 0.0  ;;  %vm789_vm6 = vcmp.eq.s32.totalorder %v1583_v8, 0 }
  0x78   : > { %545 = vrot.lane.b32.xlu1 %v240_v24, %s1315_s5 }
  0x79   : > { %548 = vrot.lane.b32.xlu0 %v241_v25, %s1315_s5 }
  0x7c   : > { %262 = vrot.lane.b32.xlu1 %v258_v26, %s1316_s20 }
  0x7d   : > { %255 = vrot.lane.b32.xlu0 %v995_v27, %s1316_s20 }
  0xc8   : > { %v246_v28 = vpop.permute.xlu0 %245 }
  0xc9   : > { %v247_v29 = vsel %vm244_vm2, %v246_v28, %v1511_v1 }
  0xca   : > { %248 = vrot.lane.b32.xlu1 %v247_v29, %s1315_s5 }
  0xe6   : > { %v292_v30 = vpop.permute.xlu1 %291 }
  0xe7   : > { %v289_v31 = vpop.permute.xlu0 %288  ;;  %v293_v32 = vsel %vm244_vm2, %v292_v30, %v1535_v22 }
  0xe8   : > { %296 = vrot.lane.b32.xlu0 %v293_v32, %s1315_s5  ;;  %v290_v33 = vsel %vm244_vm2, %v289_v31, %v1539_v23 }
  0xe9   : > { %294 = vrot.lane.b32.xlu1 %v290_v33, %s1315_s5 }
  0xea   : > { %v546_v34 = vpop.permute.xlu1 %545 }
  0xeb   : > { %v549_v35 = vpop.permute.xlu0 %548  ;;  %v547_v36 = vsel %vm244_vm2, %v546_v34, %v240_v24 }
  0xec   : > { %551 = vrot.lane.b32.xlu0 %v547_v36, %s1315_s5  ;;  %v550_v37 = vsel %vm244_vm2, %v549_v35, %v241_v25 }
  0xed   : > { %553 = vrot.lane.b32.xlu1 %v550_v37, %s1315_s5  ;;  %s1321_s5 = smov [#allocation7]  }
  0xee   : > { %v263_v42 = vpop.permute.xlu1 %262  ;;  %s1243_s20 = sshll.u32 %s1321_s5, 4  ;;  %s1244_s20 = int_to_ptr.vmem [resolvable:$false] %s1243_s20 }
  0xef   : > { %v256_v43 = vpop.permute.xlu0 %255  ;;  %p1246_p5 = scmp.lt.s32.totalorder %s1665_s4, %s1244_s20 }
  0xf0   : > { %252 = vrot.lane.b32.xlu0 %v995_v27, %s1317_s6 }
  0xf1   : > { %259 = vrot.lane.b32.xlu1 %v258_v26, %s1317_s6 }
  0xf4   : > { %330 = vrot.lane.b32.xlu0 %v326_v38, %s1317_s6 }
  0xf5   : > { %332 = vrot.lane.b32.xlu1 %v327_v39, %s1317_s6 }
  0xf8   : > { %587 = vrot.lane.b32.xlu0 %v583_v40, %s1317_s6 }
  0xf9   : > { %589 = vrot.lane.b32.xlu1 %v584_v41, %s1317_s6  ;;  %s1245_s6 = scalar_lea.vmem %s1244_s20, 256 }
  0xfa   : > { %p1247_p7 = scmp.lt.s32.totalorder %s1245_s6, %s1239_s13 }
  0xfc   : > { %p1248_p9 = por %p1247_p7, %p1246_p5 }
  0xfe   : > { %p1249_p11 = pnand %p1248_p9, %p1242_p10 }
 0x13c   : > { %v249_v44 = vpop.permute.xlu1 %248 }
 0x13d   : > { %v1564_v47 = vsel %vm244_vm2, %v249_v44, %v1511_v1 }
 0x13e   : > { %vm257_vm3 = vcmp.eq.s32.totalorder %v1564_v47, %v256_v43  ;;  %vm264_vm4 = vcmp.eq.s32.totalorder %v1564_v47, %v263_v42 }
 0x15a   : > { %v297_v45 = vpop.permute.xlu0 %296 }
 0x15b   : > { %v295_v46 = vpop.permute.xlu1 %294  ;;  %v299_v53 = vsel %vm244_vm2, %v297_v45, %v1535_v22 }
 0x15c   : > { %v298_v55 = vsel %vm244_vm2, %v295_v46, %v1539_v23  ;;  %v301_v56 = vsel %vm257_vm3, %v299_v53, 0.0  ;;  %v313_v59 = vsel %vm264_vm4, %v299_v53, 0.0 }
 0x15d   : > { %v300_v57 = vsel %vm257_vm3, %v298_v55, 0.0  ;;  %v312_v58 = vsel %vm264_vm4, %v298_v55, 0.0 }
 0x15e   : > { %v552_v48 = vpop.permute.xlu0 %551 }
 0x15f   : > { %v554_v49 = vpop.permute.xlu1 %553  ;;  %v1568_v50 = vsel %vm244_vm2, %v552_v48, %v240_v24 }
 0x160   : > { %v1571_v51 = vsel %vm244_vm2, %v554_v49, %v241_v25  ;;  %v557_v52 = vsel %vm257_vm3, %v1568_v50, 0.0  ;;  %v569_v60 = vsel %vm264_vm4, %v1568_v50, 0.0  ;;  %v282_v25 = vsel %vm280_vm8, 1.0, %v1319_v17 }
 0x161   : > { %v558_v54 = vsel %vm257_vm3, %v1571_v51, 0.0  ;;  %561 = vrot.lane.b32.xlu0 %v557_v52, %s1318_s14  ;;  %v570_v61 = vsel %vm264_vm4, %v1571_v51, 0.0  ;;  %v1592_v26 = vadd.f32 %v282_v25, %v278_v21  ;;  %v1594_v27 = vsub.f32 %v276_v19, %v282_v25 }
 0x162   : > { %563 = vrot.lane.b32.xlu1 %v558_v54, %s1318_s14  ;;  %v253_v62 = vpop.permute.xlu0 %252  ;;  %v228_v25 = vmul.f32 %v1527_v14, %v1517_v3  ;;  %vm820_vm8 = vcmp.eq.s32.totalorder %v1583_v8, 2 }
 0x163   : > { %v260_v63 = vpop.permute.xlu1 %259  ;;  %vm254_vm7 = vcmp.eq.s32.totalorder %v1564_v47, %v253_v62  ;;  %1030 = vmatprep.mubr.msk.f32.mxu0 %vm348_vm10, %v1592_v26  ;;  %1037 = vmatprep.mubr.msk.f32.mxu1 %vm348_vm10, %v1594_v27 }
 0x164   : > { %vm261_vm9 = vcmp.eq.s32.totalorder %v1564_v47, %v260_v63 }
 0x165   : > { %306 = vrot.lane.b32.xlu0 %v301_v56, %s1318_s14 }
 0x166   : > { %304 = vrot.lane.b32.xlu1 %v300_v57, %s1318_s14  ;;  %v331_v4 = vpop.permute.xlu0 %330  ;;  %v267_v57 = vadd.s32 8, %v1583_v8 }
 0x167   : > { %v333_v5 = vpop.permute.xlu1 %332 }
 0x169   : > { %316 = vrot.lane.b32.xlu0 %v312_v58, %s1318_s14 }
 0x16a   : > { %318 = vrot.lane.b32.xlu1 %v313_v59, %s1318_s14  ;;  %v588_v6 = vpop.permute.xlu0 %587 }
 0x16b   : > { %v590_v7 = vpop.permute.xlu1 %589 }
 0x16d   : > { %573 = vrot.lane.b32.xlu0 %v569_v60, %s1318_s14 }
 0x16e   : > { %575 = vrot.lane.b32.xlu1 %v570_v61, %s1318_s14 }
 0x1d3   : > { %v562_v9 = vpop.permute.xlu0 %561 }
 0x1d4   : > { %v564_v10 = vpop.permute.xlu1 %563  ;;  %v567_v30 = vsel %vm254_vm7, %v1568_v50, %v562_v9 }
 0x1d5   : > { %v568_v34 = vsel %vm254_vm7, %v1571_v51, %v564_v10  ;;  %v593_v40 = vadd.f32 %v588_v6, %v567_v30 }
 0x1d6   : > { %v594_v42 = vadd.f32 %v590_v7, %v568_v34 }
 0x1d7   : > { %v307_v16 = vpop.permute.xlu0 %306 }
 0x1d8   : > { %v305_v20 = vpop.permute.xlu1 %304  ;;  %v311_v24 = vsel %vm254_vm7, %v299_v53, %v307_v16 }
 0x1d9   : > { %v310_v0 = vsel %vm254_vm7, %v298_v55, %v305_v20  ;;  %v337_v31 = vadd.f32 %v333_v5, %v311_v24  ;;  %vm804_vm7 = vcmp.eq.s32.totalorder %v1583_v8, 1 }
 0x1da   : > { %v336_v28 = vadd.f32 %v331_v4, %v310_v0 }
 0x1db   : > { %v317_v29 = vpop.permute.xlu0 %316 }
 0x1dc   : > { %v319_v32 = vpop.permute.xlu1 %318  ;;  %v322_v33 = vsel %vm261_vm9, %v298_v55, %v317_v29 }
 0x1dd   : > { %v323_v35 = vsel %vm261_vm9, %v299_v53, %v319_v32  ;;  %v324_v36 = vsub.f32 %v322_v33, %v310_v0  ;;  %v338_v37 = vadd.f32 %v336_v28, %v322_v33  ;;  %v226_v0 = vmax.f32 %v1517_v3, 0.0  ;;  %v1168_v28 = vpop.eup %1167 }
 0x1de   : > { %v325_v38 = vsub.f32 %v323_v35, %v311_v24  ;;  %v339_v39 = vadd.f32 %v337_v31, %v323_v35  ;;  %v227_v24 = vmax.f32 %v1515_v2, 0.0  ;;  %v233_v31 = vmul.f32 0.6931472, %v1168_v28 }
 0x1df   : > { %v574_v41 = vpop.permute.xlu0 %573  ;;  %v230_v29 = vsub.f32 %v226_v0, %v228_v25 }
 0x1e0   : > { %v576_v43 = vpop.permute.xlu1 %575  ;;  %v579_v44 = vsel %vm261_vm9, %v1568_v50, %v574_v41  ;;  %v1149_v45 = vpack.i.bf16 %v339_v39, %v338_v37  ;;  %v1139_v46 = vpack.i.bf16 %v325_v38, %v324_v36  ;;  %v269_v50 = vsub.s32 %v1511_v1, %v267_v57 }
 0x1e1   : > { %v580_v48 = vsel %vm261_vm9, %v1571_v51, %v576_v43  ;;  %v581_v49 = vsub.f32 %v579_v44, %v567_v30  ;;  %v595_v52 = vadd.f32 %v593_v40, %v579_v44  ;;  %v236_v33 = vadd.f32 %v233_v31, %v230_v29 }
 0x1e2   : > { %v582_v53 = vsub.f32 %v580_v48, %v568_v34  ;;  %v596_v54 = vadd.f32 %v594_v42, %v580_v48  ;;  %1150 = vrot.lane.b32.xlu1 %v1149_v45, %s1320_s17  ;;  %1140 = vrot.lane.b32.xlu0 %v1139_v46, %s1320_s17  ;;  %vm271_vm11 = vcmp.eq.s32.totalorder %v269_v50, 0  ;;  %vm275_vm12 = vcmp.eq.s32.totalorder %v269_v50, 1 }
 0x1e3   : > { %v273_v58 = vsel %vm271_vm11, 2.0, %v1319_v17  ;;  %v277_v47 = vsel %vm275_vm12, 1.0, %v1319_v17  ;;  %vm281_vm13 = vcmp.eq.s32.totalorder %v269_v50, 4294967295  ;;  %v807_v34 = vadd.f32 %v806_v12, %v805_v13 }
 0x1e4   : > { %v1154_v55 = vpack.i.bf16 %v596_v54, %v595_v52  ;;  %v1144_v56 = vpack.i.bf16 %v582_v53, %v581_v49  ;;  %v279_v60 = vadd.f32 %v277_v47, %v273_v58  ;;  %v283_v61 = vsel %vm281_vm13, 1.0, %v1319_v17 }
 0x1e5   : > { %v287_v16 = vsub.f32 %v277_v47, %v283_v61  ;;  %v790_v3 = vsel %vm348_vm10, %v236_v33, 0.0  ;;  %v822_v37 = vsel %vm348_vm10, %v1529_v15, 0.0  ;;  %v837_v38 = vmul.f32 %v1539_v23, %v1527_v14 }
 0x1e6   : > { %1155 = vrot.lane.b32.xlu1 %v1154_v55, %s1320_s17  ;;  %1145 = vrot.lane.b32.xlu0 %v1144_v56, %s1320_s17  ;;  %v285_v11 = vadd.f32 %v283_v61, %v279_v60  ;;  %v838_v39 = vmul.f32 %v1535_v22, %v1529_v15  ;;  %vm836_vm9 = vcmp.eq.s32.totalorder %v1583_v8, 3 }
 0x1e7   : > { %v839_v42 = vsel %vm348_vm10, %v837_v38, 0.0 }
 0x1e8   : > { %v840_v43 = vsel %vm348_vm10, %v838_v39, 0.0 }
 0x1e9   : > { %v841_v44 = vadd.f32 %v840_v43, %v839_v42 }
 0x20a   : > { %808 = vadd.xlane.f32.xlu1 %v807_v34 }
 0x254   : > { %v1151_v51 = vpop.permute.xlu1 %1150  ;;  %v1141_v59 = vpop.permute.xlu0 %1140 }
 0x255   : > { %v1153_v62 = vunpack.i.h.bf16 %v1151_v51  ;;  %v1152_v63 = vunpack.i.l.bf16 %v1151_v51  ;;  %v1143_v4 = vunpack.i.h.bf16 %v1141_v59  ;;  %v1142_v5 = vunpack.i.l.bf16 %v1141_v59 }
 0x257   : > { %v1054_v6 = vpack.c.bf16 %v1143_v4, %v1142_v5  ;;  %v1058_v7 = vpack.c.bf16 %v1153_v62, %v1152_v63 }
 0x258   : > { %v1156_v9 = vpop.permute.xlu1 %1155  ;;  %v1146_v10 = vpop.permute.xlu0 %1145 }
 0x259   : > { %v1158_v1 = vunpack.i.h.bf16 %v1156_v9  ;;  %v1157_v18 = vunpack.i.l.bf16 %v1156_v9  ;;  %v1148_v19 = vunpack.i.h.bf16 %v1146_v10  ;;  %v1147_v20 = vunpack.i.l.bf16 %v1146_v10  ;;  %1055 = vmatprep.subr.bf16.mxu0 %v1054_v6  ;;  %1059 = vmatprep.subr.bf16.mxu1 %v1058_v7 }
 0x25a   : > { %1057 = vmatpush3.bf16.msra.mxu0 %v1054_v6  ;;  %1061 = vmatpush3.bf16.msra.mxu1 %v1058_v7 }
 0x25b   : > { %v1066_v21 = vpack.c.bf16 %v1158_v1, %v1157_v18  ;;  %v1062_v17 = vpack.c.bf16 %v1148_v19, %v1147_v20 }
 0x25d   : > { %1031 = vmatmul.mubr.msk.f32.vlgmr.msra.gmra.mrb[0].mxu0 %vm348_vm10, %v285_v11  ;;  %1038 = vmatmul.mubr.msk.f32.vlgmr.msra.gmra.mrb[0].mxu1 %vm348_vm10, %v287_v16 }
 0x25e   : > { %1063 = vmatprep.subr.bf16.mxu0 %v1062_v17  ;;  %1067 = vmatprep.subr.bf16.mxu1 %v1066_v21 }
 0x25f   : > { %1065 = vmatpush3.bf16.msra.mxu0 %v1062_v17  ;;  %1069 = vmatpush3.bf16.msra.mxu1 %v1066_v21 }
 0x260   : > { %1044 = vmatprep.mubr.msk.f32.mxu0 %vm348_vm10, %v1592_v26  ;;  %1051 = vmatprep.mubr.msk.f32.mxu1 %vm348_vm10, %v1594_v27  ;;  %v229_v26 = vmul.f32 %v1529_v15, %v1515_v2  ;;  %v1170_v27 = vpop.eup %1169  ;;  %v821_v2 = vsel %vm348_vm10, %v1527_v14, 0.0 }
 0x261   : > { %v235_v32 = vmul.f32 0.6931472, %v1170_v27  ;;  %v823_v41 = vadd.f32 %v822_v37, %v821_v2 }
 0x262   : > { %1045 = vmatmul.mubr.msk.f32.vlgmr.msra.gmra.mrb[2].mxu0 %vm348_vm10, %v285_v11  ;;  %1052 = vmatmul.mubr.msk.f32.vlgmr.msra.gmra.mrb[2].mxu1 %vm348_vm10, %v287_v16  ;;  %v231_v30 = vsub.f32 %v227_v24, %v229_v26 }
 0x264   : > { %v237_v35 = vadd.f32 %v235_v32, %v231_v30 }
 0x266   : > { %v791_v36 = vsel %vm348_vm10, %v237_v35, 0.0 }
 0x267   : > { %v792_v40 = vadd.f32 %v791_v36, %v790_v3 }
 0x269   : > { %793 = vadd.xlane.f32.xlu0 %v792_v40 }
 0x26d   : > { %824 = vadd.xlane.f32.xlu0 %v823_v41 }
 0x271   : > { %842 = vadd.xlane.f32.xlu0 %v841_v44 }
 0x297   : > { %v809_v34 = vpop.xlane.xlu1 %808 }
 0x298   : > { %v810_v2 = vrot.slane %v809_v34, 4 }
 0x29a   : > { %v811_v38 = vadd.f32 %v810_v2, %v809_v34 }
 0x29c   : > { %v812_v43 = vrot.slane %v811_v38, 2 }
 0x2f6   : > { %v794_v40 = vpop.xlane.xlu0 %793 }
 0x2f7   : > { %v795_v42 = vrot.slane %v794_v40, 4 }
 0x330   : > { %v1032_v45 = vpop.f32.mrb[0].mxu0  ;;  %v1039_v46 = vpop.f32.mrb[0].mxu1 }
 0x331   : > { %v520_v48 = vmul.f32 %v1032_v45, %v1032_v45  ;;  %v522_v49 = vmul.f32 %v1039_v46, %v1039_v46  ;;  %v421_v52 = vpop.f32.mrb[1].mxu0  ;;  %v510_v53 = vpop.f32.mrb[1].mxu1  ;;  %v796_v46 = vadd.f32 %v795_v42, %v794_v40 }
 0x332   : > { %v519_v14 = vmul.f32 %v421_v52, %v421_v52  ;;  %v521_v23 = vmul.f32 %v510_v53, %v510_v53  ;;  %v825_v52 = vpop.xlane.xlu0 %824 }
 0x333   : > { %v524_v54 = vadd.f32 %v522_v49, %v520_v48  ;;  %v813_v48 = vadd.f32 %v812_v43, %v811_v38  ;;  %v797_v53 = vrot.slane %v796_v46, 2 }
 0x334   : > { %v523_v15 = vadd.f32 %v521_v23, %v519_v14  ;;  %v826_v14 = vrot.slane %v825_v52, 4 }
 0x335   : > { %v526_v22 = vadd.f32 1e-06, %v524_v54  ;;  %v1046_v55 = vpop.f32.mrb[2].mxu0  ;;  %v1053_v56 = vpop.f32.mrb[2].mxu1  ;;  %v814_v23 = vrot.slane %v813_v48, 1 }
 0x336   : > { %v525_v57 = vadd.f32 1e-06, %v523_v15  ;;  %v764_v50 = vmul.f32 %v1046_v55, %v1046_v55  ;;  %v766_v58 = vmul.f32 %v1053_v56, %v1053_v56  ;;  %v671_v47 = vpop.f32.mrb[3].mxu0  ;;  %v754_v51 = vpop.f32.mrb[3].mxu1  ;;  %v827_v54 = vadd.f32 %v826_v14, %v825_v52 }
 0x337   : > { %1171 = vrsqrt.f32 %v526_v22  ;;  %v763_v59 = vmul.f32 %v671_v47, %v671_v47  ;;  %v765_v60 = vmul.f32 %v754_v51, %v754_v51  ;;  %vm536_vm14 = vcmp.eq.f32.partialorder %v526_v22, inf }
 0x338   : > { %1173 = vrsqrt.f32 %v525_v57  ;;  %v768_v61 = vadd.f32 %v766_v58, %v764_v50  ;;  %vm529_vm15 = vcmp.eq.f32.partialorder %v525_v57, inf  ;;  %v539_v11 = vand.u32 2147483648, %v526_v22 }
 0x339   : > { %v767_v62 = vadd.f32 %v765_v60, %v763_v59  ;;  %v532_v1 = vand.u32 2147483648, %v525_v57  ;;  %vm538_vm0 = vcmp.eq.f32.partialorder %v526_v22, 0.0  ;;  %vm531_vm1 = vcmp.eq.f32.partialorder %v525_v57, 0.0 }
 0x33a   : > { %v770_v63 = vadd.f32 1e-06, %v768_v61  ;;  %v798_v15 = vadd.f32 %v797_v53, %v796_v46  ;;  %v828_v55 = vrot.slane %v827_v54, 2  ;;  %v815_v50 = vadd.f32 %v814_v23, %v813_v48 }
 0x33b   : > { %v769_v4 = vadd.f32 1e-06, %v767_v62 }
 0x33c   : > { %1175 = vrsqrt.f32 %v770_v63  ;;  %vm780_vm2 = vcmp.eq.f32.partialorder %v770_v63, inf  ;;  %vm782_vm3 = vcmp.eq.f32.partialorder %v770_v63, 0.0  ;;  %v783_v24 = vand.u32 2147483648, %v770_v63 }
 0x33d   : > { %1177 = vrsqrt.f32 %v769_v4  ;;  %vm773_vm4 = vcmp.eq.f32.partialorder %v769_v4, inf  ;;  %v776_v26 = vand.u32 2147483648, %v769_v4  ;;  %vm775_vm5 = vcmp.eq.f32.partialorder %v769_v4, 0.0 }
 0x33e   : > { %v829_v51 = vadd.f32 %v828_v55, %v827_v54 }
 0x340   : > { %v830_v60 = vrot.slane %v829_v51, 1 }
 0x341   : > { %v1172_v5 = vpop.eup %1171 }
 0x342   : > { %v1174_v6 = vpop.eup %1173  ;;  %v535_v7 = vmul.f32 %v1172_v5, %v526_v22  ;;  %v831_v62 = vadd.f32 %v830_v60, %v829_v51 }
 0x343   : > { %v528_v9 = vmul.f32 %v1174_v6, %v525_v57 }
 0x344   : > { %v537_v10 = vsel %vm536_vm14, %v526_v22, %v535_v7  ;;  %v843_v22 = vpop.xlane.xlu0 %842 }
 0x345   : > { %v530_v16 = vsel %vm529_vm15, %v525_v57, %v528_v9  ;;  %v540_v19 = vsel %vm538_vm0, %v539_v11, %v537_v10  ;;  %v844_v56 = vrot.slane %v843_v22, 4  ;;  %v799_v57 = vrot.slane %v798_v15, 1 }
 0x346   : > { %v1176_v18 = vpop.eup %1175  ;;  %v533_v21 = vsel %vm531_vm1, %v532_v1, %v530_v16  ;;  %v542_v25 = vmax.f32 %v540_v19, 0.0 }
 0x347   : > { %v1178_v20 = vpop.eup %1177  ;;  %v779_v17 = vmul.f32 %v1176_v18, %v770_v63  ;;  %v541_v27 = vmax.f32 %v533_v21, 0.0  ;;  %v845_v58 = vadd.f32 %v844_v56, %v843_v22  ;;  %v800_v47 = vadd.f32 %v799_v57, %v798_v15 }
 0x348   : > { %v772_v0 = vmul.f32 %v1178_v20, %v769_v4  ;;  %v544_v12 = vmin.f32 %v542_v25, 10.0 }
 0x349   : > { %v781_v28 = vsel %vm780_vm2, %v770_v63, %v779_v17  ;;  %v543_v35 = vmin.f32 %v541_v27, 10.0  ;;  %v846_v59 = vrot.slane %v845_v58, 2  ;;  %1070 = vpush %v800_v47 }
 0x34a   : > { %v774_v29 = vsel %vm773_vm4, %v769_v4, %v772_v0  ;;  %v784_v30 = vsel %vm782_vm3, %v783_v24, %v781_v28  ;;  %1072 = vpush %v815_v50 }
 0x34b   : > { %v777_v31 = vsel %vm775_vm5, %v776_v26, %v774_v29  ;;  %v786_v32 = vmax.f32 %v784_v30, 0.0  ;;  %v847_v61 = vadd.f32 %v846_v59, %v845_v58  ;;  %1074 = vpush %v831_v62 }
 0x34c   : > { %v785_v13 = vmax.f32 %v777_v31, 0.0 }
 0x34d   : > { %v788_v33 = vmin.f32 %v786_v32, 10.0  ;;  %v848_v63 = vrot.slane %v847_v61, 1 }
 0x34e   : > { %v787_v3 = vmin.f32 %v785_v13, 10.0 }
 0x34f   : > { %v856_v36 = vsub.f32 %v544_v12, %v788_v33  ;;  %v849_v4 = vadd.f32 %v848_v63, %v847_v61 }
 0x350   : > { %v855_v37 = vsub.f32 %v543_v35, %v787_v3 }
 0x351   : > { %v858_v39 = vand.u32 2147483647, %v856_v36  ;;  %1076 = vpush %v849_v4 }
 0x352   : > { %v857_v41 = vand.u32 2147483647, %v855_v37 }
 0x353   : > { %v860_v44 = vsel %vm348_vm10, %v858_v39, 0.0 }
 0x354   : > { %v859_v45 = vsel %vm348_vm10, %v857_v41, 0.0  ;;  %vm854_vm10 = vcmp.eq.s32.totalorder %v1583_v8, 4 }
 0x355   : > { %v861_v49 = vadd.f32 %v860_v44, %v859_v45 }
 0x357   : > { %862 = vadd.xlane.f32.xlu1 %v861_v49 }
 0x37a   : > { %s1071_s28 = spop %1070 }
 0x37b   : > { %s1073_s24 = spop %1072  ;;  %v802_v1 = vstv %s1071_s28 }
 0x37c   : > { %v817_v18 = vstv %s1073_s24  ;;  %s1075_s26 = spop %1074  ;;  %v803_v19 = vsel %vm789_vm6, %v802_v1, 0.0 }
 0x37d   : > { %v818_v20 = vsel %vm804_vm7, %v817_v18, 0.0  ;;  %v833_v21 = vstv %s1075_s26 }
 0x37e   : > { %v819_v17 = vadd.f32 %v818_v20, %v803_v19  ;;  %v834_v0 = vsel %vm820_vm8, %v833_v21, 0.0 }
 0x380   : > { %v835_v25 = vadd.f32 %v834_v0, %v819_v17 }
 0x382   : > { %s1077_s27 = spop %1076 }
 0x383   : > { %v851_v24 = vstv %s1077_s27 }
 0x384   : > { %v852_v26 = vsel %vm836_vm9, %v851_v24, 0.0 }
 0x385   : > { %v853_v28 = vadd.f32 %v852_v26, %v835_v25 }
 0x3e4   : > { %v863_v5 = vpop.xlane.xlu1 %862 }
 0x3e5   : > { %v864_v6 = vrot.slane %v863_v5, 4 }
 0x3e7   : > { %v865_v7 = vadd.f32 %v864_v6, %v863_v5 }
 0x3e9   : > { %v866_v9 = vrot.slane %v865_v7, 2 }
 0x3eb   : > { %v867_v10 = vadd.f32 %v866_v9, %v865_v7 }
 0x3ed   : > { %v868_v11 = vrot.slane %v867_v10, 1 }
 0x3ef   : > { %v869_v16 = vadd.f32 %v868_v11, %v867_v10 }
 0x3f1   : > { %1078 = vpush %v869_v16 }
 0x422   : > { %s1079_s8 = spop %1078 }
 0x423   : > { %v871_v27 = vstv %s1079_s8 }
 0x424   : > { %v872_v29 = vsel %vm854_vm10, %v871_v27, 0.0 }
 0x425   : > { %v873_v30 = vadd.f32 %v872_v29, %v853_v28 }
 0x427   : > { %874 = vst [vmem:[%s201_s16] sm:$0xff] %v873_v30 }
 0x428   : > { %1252 = shalt.err (!%p1249_p11)
}
 0x429   : > { %s1253_s30 = scalar_lea.hbm %s1663_s23, 128  ;;  %s1257_s28 = scalar_lea.hbm %s1709_s2, 256 }
 0x42a   : > { %p1254_p3 = scmp.ne.s32.totalorder %s1663_s23, %s1253_s30  ;;  %p1258_p2 = scmp.lt.u32.totalorder %s1663_s23, %s1709_s2 }
 0x42b   : > { %p1259_p4 = scmp.lt.u32.totalorder %s1257_s28, %s1253_s30  ;;  %p1261_p13 = scmp.lt.u32.totalorder %s1253_s30, %s1663_s23 }
 0x42c   : > { %p1255_p8 = pnand %p1254_p3, %p1719_p1 }
 0x42d   : > { %p1260_p6 = por %p1259_p4, %p1258_p2 }
 0x42e   : > { %p1256_p0 = pneg %p1255_p8 }
 0x42f   : > { %p1262_p12 = por %p1261_p13, %p1260_p6 }
 0x431   : > { %p1263_p10 = pnand %p1262_p12, %p1256_p0 }
 0x433   : > { %1266 = shalt.err (!%p1263_p10)
}
 0x434   : > { %1084 = dma.vmem_to_hbm [thread:$0]  (%p1719_p1), %s1665_s4, 128, %s1663_s23, %s876_s29  }
 0x435 PF: > { %s901_s27 = sand.u32 1, %s1297_s9   ;;  %p1720_p5 = scmp.ne.s32.totalorder %s1715_s22, 0 }
 0x436   : > { %p1721_p7 = scmp.ge.s32.totalorder %s1309_s12, 2  ;;  %s902_s25 = scalar_lea.sflag [#allocation4], %s901_s27 }
 0x438   : > { %p1094_p9 = pnand %p1721_p7, %p1720_p5 }
 0x43a   : > { %1292 = dma.done.wait (!%p1094_p9), %s902_s25, 128  }
 0x43b   : > { %1294 = vsyncadd (!%p1094_p9), %s902_s25, 4294967168  ;;  %p18_p11 = scmp.ge.s32.totalorder %s1362_s15, 4   ;;  %s1722_s9 = smov %s1301_s10 }
 0x43c   : > { %s1723_s10 = smov %s1305_s11  ;;  %s1724_s11 = smov %s1374_s18 }
 0x43d   : > { %s1725_s12 = smov %s1362_s15  ;;  %20 = sbr.rel (!%p18_p11) target bundleno = 7 (0x7), region = 86 }
 0x444   :  { %907 = vsyncpa [#allocation3], 1 }
 0x445   :  { %909 = vsyncpa [#allocation3 + $0x1], 1 }
 0x446   :  { %910 = vsyncpa [#allocation6], 1 }
 0x447   :  { %912 = vsyncpa [#allocation6 + $0x1], 1 }
 0x448   :  { %913 = vsyncpa [#allocation4], 1 }
 0x449   :  { %915 = vsyncpa [#allocation4 + $0x1], 1 }

</bundles_post_ra>
